<compile_context>
chip_gen: v7x
topology: tpu7x:2x2x1
jax: 0.10.0
libtpu: 0.0.40
codegen_flags: <defaults>
</compile_context>

<pallas_src>
import jax
import jax.numpy as jnp
from jax.experimental import pallas as pl
from jax.experimental.pallas import tpu as pltpu

VOCAB_SIZE = 100
EMBED_DIM = 200
MAX_LENGTH = 5

LANE = 128
SUBLANE = 8
DEFAULT_TILE_N = 1024  # big row tiles: ~85%+ of HBM writeback roofline at scale


def build_embedding_table(word_emb, pos_emb):
    """Build the combined [word ; position] table ONCE at init time.

    Rows [0, V) = word table, rows [V, V+L) = position table, rows [V+L, 128)
    = zero padding so the selector/matmul K dimension is a dense 128 tile.
    Hoisted out of the per-call path so it is not rebuilt every forward.
    """
    V, E = word_emb.shape
    L = pos_emb.shape[0]
    vl_pad = pl.cdiv(V + L, LANE) * LANE
    table = jnp.zeros((vl_pad, E), jnp.float32)
    table = table.at[:V].set(word_emb.astype(jnp.float32))
    table = table.at[V:V + L].set(pos_emb.astype(jnp.float32))
    return table


def token_and_position_embedding(x, table, *, vocab_size=VOCAB_SIZE,
                                 max_length=MAX_LENGTH,
                                 tile_n=DEFAULT_TILE_N):
    """x: (B, S) int ids, table: pre-built (128, E) combined table -> (B, S, E) f32."""
    B, S = x.shape
    VL_pad, E = table.shape
    V = vocab_size
    assert S <= max_length, f"seq_length {S} exceeds position table size {max_length}"
    assert V + max_length <= VL_pad

    N = B * S
    # Biggest tile up to DEFAULT_TILE_N (multiple of 128 -> clean on v5e's 128-row
    # MXU and splits across v7x's two TCs when N is large); shrink to the next
    # multiple of the 8-row sublane quantum for tiny inputs.
    tile_n = min(tile_n, pl.cdiv(N, SUBLANE) * SUBLANE)
    grid = (pl.cdiv(N, tile_n),)  # ragged last block handled by Pallas; no row padding

    ids = x.reshape(N, 1).astype(jnp.int32)  # only wrapper-side data prep

    def kernel(ids_ref, table_ref, out_ref):
        n_rows = ids_ref.shape[0]
        vl = table_ref.shape[0]

        # Token hot: clamp in-kernel (ragged-tail garbage rows are also made safe;
        # their output rows are never written back).
        tok = jnp.clip(ids_ref[...], 0, V - 1)                                # (n_rows, 1)

        # Position hot: global row r = i*tile_n + local; position = r % S, shifted
        # by V into the combined table.  Scalar part of the modulo is done on the
        # scalar unit so the vector values stay tiny.
        base_mod = (pl.program_id(0) * n_rows) % S                            # scalar
        local = jax.lax.broadcasted_iota(jnp.int32, (n_rows, 1), 0)
        pos = (base_mod + local) % S + V                                      # (n_rows, 1)

        # Two-hot selector: tok < V and pos >= V are always disjoint, so one MXU
        # matmul performs both gathers and the word+position add at once.
        iota_l = jax.lax.broadcasted_iota(jnp.int32, (n_rows, vl), 1)
        sel = ((iota_l == tok) | (iota_l == pos)).astype(jnp.float32)
        out_ref[...] = jnp.dot(sel, table_ref[...],
                               preferred_element_type=jnp.float32)

    out = pl.pallas_call(
        kernel,
        out_shape=jax.ShapeDtypeStruct((N, E), jnp.float32),
        grid=grid,
        in_specs=[
            pl.BlockSpec((tile_n, 1), lambda i: (i, 0)),       # per-row token ids
            pl.BlockSpec((VL_pad, E), lambda i: (0, 0)),       # combined table: VMEM-resident
        ],
        out_specs=pl.BlockSpec((tile_n, E), lambda i: (i, 0)),  # E == full dim -> no post-slice
        compiler_params=pltpu.CompilerParams(
            dimension_semantics=("parallel",),                 # megacore-shard row tiles (v7x)
        ),
    )(ids, table)

    return out.reshape(B, S, E)  # pure metadata reshape, no extra HBM pass


if __name__ == "__main__":
    key = jax.random.PRNGKey(0)
    k_w, k_p = jax.random.split(key)

    # nn.Embedding initializes weights ~ N(0, 1); do the same deterministically.
    word_emb = jax.random.normal(k_w, (VOCAB_SIZE, EMBED_DIM), dtype=jnp.float32)
    pos_emb = jax.random.normal(k_p, (MAX_LENGTH, EMBED_DIM), dtype=jnp.float32)

    # Combined table is built once at "init", not per forward call.
    table = build_embedding_table(word_emb, pos_emb)
    table = jax.block_until_ready(table)

    # Same example input as the PyTorch script: x = [[1,2,3],[4,5,6]]  (B=2, S=3)
    x = jnp.array([[1, 2, 3], [4, 5, 6]], dtype=jnp.int32)

    out = token_and_position_embedding(x, table)
    out = jax.block_until_ready(out)

    # Pure-JAX reference check (gather + add).
    B, S = x.shape
    ref = word_emb[x] + pos_emb[jnp.arange(S)][None, :, :]
    assert out.shape == (B, S, EMBED_DIM)
    assert jnp.allclose(out, ref, atol=1e-5, rtol=1e-5)

    print("KERNEL_OK")
</pallas_src>

<mosaic_0001>
module attributes {stable_mosaic.version = 11 : i64} {
  func.func @kernel(%arg0: i32, %arg1: memref<8x1xi32, #tpu.memory_space<vmem>>, %arg2: memref<128x200xf32, #tpu.memory_space<vmem>>, %arg3: memref<8x200xf32, #tpu.memory_space<vmem>>) attributes {dimension_semantics = [#tpu.dimension_semantics<parallel>], iteration_bounds = array<i64: 1>, scalar_prefetch = 0 : i64, scratch_operands = 0 : i64, tpu.core_type = #tpu.core_type<tc>, window_params = [{transform_indices = @transform_0, window_bounds = array<i64: 8, 1>}, {pipeline_mode = #tpu.pipeline_mode<synchronous>, transform_indices = @transform_1, window_bounds = array<i64: 128, 200>}, {transform_indices = @transform_2, window_bounds = array<i64: 8, 200>}]} {
    %c0 = arith.constant 0 : index
    %c0_0 = arith.constant 0 : index
    %0 = vector.load %arg1[%c0, %c0_0] : memref<8x1xi32, #tpu.memory_space<vmem>>, vector<8x1xi32>
    %c0_i32 = arith.constant 0 : i32
    %c99_i32 = arith.constant 99 : i32
    %1 = vector.broadcast %c0_i32 : i32 to vector<8x1xi32>
    %2 = arith.maxsi %1, %0 : vector<8x1xi32>
    %3 = vector.broadcast %c99_i32 : i32 to vector<8x1xi32>
    %4 = arith.minsi %3, %2 : vector<8x1xi32>
    %c8_i32 = arith.constant 8 : i32
    %5 = arith.muli %arg0, %c8_i32 : i32
    %c3_i32 = arith.constant 3 : i32
    %c0_i32_1 = arith.constant 0 : i32
    %6 = arith.cmpi eq, %c3_i32, %c0_i32_1 : i32
    %c1_i32 = arith.constant 1 : i32
    %7 = arith.select %6, %c1_i32, %c3_i32 : i32
    %8 = arith.remsi %5, %7 : i32
    %c0_i32_2 = arith.constant 0 : i32
    %9 = arith.cmpi ne, %8, %c0_i32_2 : i32
    %c0_i32_3 = arith.constant 0 : i32
    %10 = arith.cmpi slt, %8, %c0_i32_3 : i32
    %c0_i32_4 = arith.constant 0 : i32
    %11 = arith.cmpi slt, %7, %c0_i32_4 : i32
    %12 = arith.xori %10, %11 : i1
    %13 = arith.andi %12, %9 : i1
    %14 = arith.addi %8, %7 : i32
    %15 = arith.select %13, %14, %8 : i32
    %16 = tpu.iota {dimensions = array<i32: 0>} : vector<8x1xi32>
    %17 = vector.broadcast %15 : i32 to vector<8x1xi32>
    %18 = arith.addi %17, %16 : vector<8x1xi32>
    %c3_i32_5 = arith.constant 3 : i32
    %c0_i32_6 = arith.constant 0 : i32
    %19 = arith.cmpi eq, %c3_i32_5, %c0_i32_6 : i32
    %c1_i32_7 = arith.constant 1 : i32
    %20 = arith.select %19, %c1_i32_7, %c3_i32_5 : i32
    %21 = vector.broadcast %20 : i32 to vector<8x1xi32>
    %22 = arith.remsi %18, %21 : vector<8x1xi32>
    %c0_i32_8 = arith.constant 0 : i32
    %23 = vector.broadcast %c0_i32_8 : i32 to vector<8x1xi32>
    %24 = arith.cmpi ne, %22, %23 : vector<8x1xi32>
    %c0_i32_9 = arith.constant 0 : i32
    %25 = vector.broadcast %c0_i32_9 : i32 to vector<8x1xi32>
    %26 = arith.cmpi slt, %22, %25 : vector<8x1xi32>
    %c0_i32_10 = arith.constant 0 : i32
    %27 = arith.cmpi slt, %20, %c0_i32_10 : i32
    %28 = vector.broadcast %27 : i1 to vector<8x1xi1>
    %29 = vector.broadcast %28 : vector<8x1xi1> to vector<8x1xi1>
    %30 = arith.xori %26, %29 : vector<8x1xi1>
    %31 = arith.andi %30, %24 : vector<8x1xi1>
    %32 = vector.broadcast %20 : i32 to vector<8x1xi32>
    %33 = arith.addi %22, %32 : vector<8x1xi32>
    %34 = arith.select %31, %33, %22 : vector<8x1xi1>, vector<8x1xi32>
    %c100_i32 = arith.constant 100 : i32
    %35 = vector.broadcast %c100_i32 : i32 to vector<8x1xi32>
    %36 = arith.addi %34, %35 : vector<8x1xi32>
    %37 = tpu.iota {dimensions = array<i32: 1>} : vector<8x128xi32>
    %38 = vector.broadcast %4 : vector<8x1xi32> to vector<8x128xi32>
    %39 = arith.cmpi eq, %37, %38 : vector<8x128xi32>
    %40 = vector.broadcast %36 : vector<8x1xi32> to vector<8x128xi32>
    %41 = arith.cmpi eq, %37, %40 : vector<8x128xi32>
    %42 = arith.ori %39, %41 : vector<8x128xi1>
    %43 = arith.extui %42 : vector<8x128xi1> to vector<8x128xi32>
    %44 = arith.sitofp %43 : vector<8x128xi32> to vector<8x128xf32>
    %c0_11 = arith.constant 0 : index
    %c0_12 = arith.constant 0 : index
    %45 = vector.load %arg2[%c0_11, %c0_12] : memref<128x200xf32, #tpu.memory_space<vmem>>, vector<128x200xf32>
    %cst = arith.constant dense<0.000000e+00> : vector<8x200xf32>
    %46 = tpu.matmul %44, %45, %cst {dimension_numbers = #tpu.dot_dimension_numbers<[1], [0], [0], [1], [0, 0, 1, 1], [], []>} : vector<8x128xf32>, vector<128x200xf32>, vector<8x200xf32> -> vector<8x200xf32>
    %c0_13 = arith.constant 0 : index
    %c0_14 = arith.constant 0 : index
    %47 = vector.load %arg3[%c0_13, %c0_14] : memref<8x200xf32, #tpu.memory_space<vmem>>, vector<8x200xf32>
    tpu.vector_store %arg3[%c0_13, %c0_14], %46 {strides = array<i32>} : memref<8x200xf32, #tpu.memory_space<vmem>>, vector<8x200xf32>,
    return
  }
  func.func @transform_0(%arg0: i32) -> (i32, i32) {
    %c0_i32 = arith.constant 0 : i32
    %c0_i32_0 = arith.constant 0 : i32
    return %arg0, %c0_i32 : i32, i32
  }
  func.func @transform_1(%arg0: i32) -> (i32, i32) {
    %c0_i32 = arith.constant 0 : i32
    %c0_i32_0 = arith.constant 0 : i32
    %c0_i32_1 = arith.constant 0 : i32
    return %c0_i32, %c0_i32_0 : i32, i32
  }
  func.func @transform_2(%arg0: i32) -> (i32, i32) {
    %c0_i32 = arith.constant 0 : i32
    %c0_i32_0 = arith.constant 0 : i32
    return %arg0, %c0_i32 : i32, i32
  }
}

</mosaic_0001>

<bundles_post_ra>
// kernel: tpu_custom_call.1
= control target key start
LH: loop header
LB: loop body
LE: loop exit
PB: predicated region body
PF: predicated region fallthrough
CT: control target
= control target key end

     0   :  { %v247_v3 = vmov 0   ;;  %v248_v23 = vmov 0.0   ;;  %s381_s0 = inlined_call_operand.vmem [shape: s32[6,1], index: 0, kind: input, shape index: {}]   ;;  %s382_s1 = inlined_call_operand.vmem [shape: f32[128,200], index: 1, kind: input, shape index: {}]   ;;  %s383_s2 = inlined_call_operand.hbm [shape: f32[6,200], index: 2, kind: output, shape index: {}]  }
   0x1   :  { %v12_v0 = vld [vmem:[%s381_s0] sm:$0xff]  ;;  %v63_v1 = vld [vmem:[%s382_s1 + $0x8] sm:$0xff]  ;;  %v65_v2 = vld [vmem:[%s382_s1 + $0x18] sm:$0xff]  ;;  %222 = vset.pattern.permute.xlu0 %v247_v3  ;;  %158 = vmatprep.mubr.f32.mxu0 %v248_v23 }
   0x2   :  { %vm13_vm0 = vcmp.gt.s32.totalorder %v12_v0, 0  ;;  %v184_v4 = vpack.c.bf16 %v65_v2, %v63_v1  ;;  %v62_v5 = vld [vmem:[%s382_s1] sm:$0xff]  ;;  %v64_v6 = vld [vmem:[%s382_s1 + $0x10] sm:$0xff]  ;;  %v67_v7 = vld [vmem:[%s382_s1 + $0x28] sm:$0xff] }
   0x3   :  { %v14_v8 = vsel %vm13_vm0, %v12_v0, 0  ;;  %v186_v9 = vpack.c.bf16 %v64_v6, %v62_v5  ;;  %v69_v10 = vld [vmem:[%s382_s1 + $0x38] sm:$0xff]  ;;  %v66_v11 = vld [vmem:[%s382_s1 + $0x20] sm:$0xff]  ;;  %v68_v12 = vld [vmem:[%s382_s1 + $0x30] sm:$0xff] }
   0x4   :  { %vm15_vm1 = vcmp.lt.s32.totalorder %v14_v8, 99  ;;  %185 = vmatprep.subr.bf16.mxu0 %v184_v4  ;;  %v188_v13 = vpack.c.bf16 %v69_v10, %v67_v7  ;;  %v71_v14 = vld [vmem:[%s382_s1 + $0x48] sm:$0xff]  ;;  %v73_v15 = vld [vmem:[%s382_s1 + $0x58] sm:$0xff]  ;;  %v190_v17 = vpack.c.bf16 %v68_v12, %v66_v11  ;;  %v70_v19 = vld [vmem:[%s382_s1 + $0x40] sm:$0xff] }
   0x5   :  { %v16_v16 = vsel %vm15_vm1, %v14_v8, 99  ;;  %187 = vmatpush1.bf16.msra.mxu0 %v186_v9  ;;  %v192_v18 = vpack.c.bf16 %v73_v15, %v71_v14  ;;  %v72_v20 = vld [vmem:[%s382_s1 + $0x50] sm:$0xff]  ;;  %v75_v21 = vld [vmem:[%s382_s1 + $0x68] sm:$0xff]  ;;  %v77_v22 = vld [vmem:[%s382_s1 + $0x78] sm:$0xff] }
   0x6   :  { %55 = vperm.xlu0 %222, %v16_v16   ;;  %189 = vmatprep.subr.bf16.mxu0 %v188_v13  ;;  %v194_v24 = vpack.c.bf16 %v72_v20, %v70_v19  ;;  %v196_v25 = vpack.c.bf16 %v77_v22, %v75_v21  ;;  %v74_v26 = vld [vmem:[%s382_s1 + $0x60] sm:$0xff]  ;;  %v76_v27 = vld [vmem:[%s382_s1 + $0x70] sm:$0xff]  ;;  %v79_v28 = vld [vmem:[%s382_s1 + $0x88] sm:$0xff] }
   0x7   :  { %v81_v29 = vld [vmem:[%s382_s1 + $0x98] sm:$0xff] }
   0x9   :  { %191 = vmatpush1.bf16.msra.mxu0 %v190_v17 }
   0xa   :  { %193 = vmatprep.subr.bf16.mxu0 %v192_v18 }
   0xb   :  { %7 = vsyncpa [#allocation3], 0  ;;  %v198_v30 = vpack.c.bf16 %v76_v27, %v74_v26  ;;  %v200_v31 = vpack.c.bf16 %v81_v29, %v79_v28  ;;  %v78_v32 = vld [vmem:[%s382_s1 + $0x80] sm:$0xff]  ;;  %v80_v33 = vld [vmem:[%s382_s1 + $0x90] sm:$0xff]  ;;  %v31_v53 = vlaneseq  ;;  %v249_v1 = vmov 1.0  }
   0xc   :  { %v83_v34 = vld [vmem:[%s382_s1 + $0xa8] sm:$0xff]  ;;  %v85_v35 = vld [vmem:[%s382_s1 + $0xb8] sm:$0xff]  ;;  %v202_v36 = vpack.c.bf16 %v80_v33, %v78_v32  ;;  %v82_v38 = vld [vmem:[%s382_s1 + $0xa0] sm:$0xff]  ;;  %vm166_vm8 = vcmask 588800  }
   0xd   :  { %195 = vmatpush1.bf16.msra.mxu0 %v194_v24  ;;  %v204_v37 = vpack.c.bf16 %v85_v35, %v83_v34  ;;  %v84_v39 = vld [vmem:[%s382_s1 + $0xb0] sm:$0xff]  ;;  %v87_v40 = vld [vmem:[%s382_s1 + $0xc8] sm:$0xff]  ;;  %v89_v41 = vld [vmem:[%s382_s1 + $0xd8] sm:$0xff]  ;;  %v32_v54 = vshrl.u32 %v31_v53, 7  ;;  %v53_v63 = vand.u32 127, %v31_v53 }
   0xe   :  { %197 = vmatprep.subr.bf16.mxu0 %v196_v25  ;;  %v206_v42 = vpack.c.bf16 %v84_v39, %v82_v38  ;;  %v208_v43 = vpack.c.bf16 %v89_v41, %v87_v40  ;;  %v86_v44 = vld [vmem:[%s382_s1 + $0xc0] sm:$0xff]  ;;  %v88_v45 = vld [vmem:[%s382_s1 + $0xd0] sm:$0xff]  ;;  %v91_v46 = vld [vmem:[%s382_s1 + $0xe8] sm:$0xff] }
   0xf   :  { %v93_v47 = vld [vmem:[%s382_s1 + $0xf8] sm:$0xff]  ;;  %v210_v48 = vpack.c.bf16 %v88_v45, %v86_v44  ;;  %v90_v50 = vld [vmem:[%s382_s1 + $0xe0] sm:$0xff]  ;;  %v92_v51 = vld [vmem:[%s382_s1 + $0xf0] sm:$0xff]  ;;  %v365_v55 = vmul.u32.u64.low 2863311531, %v32_v54  ;;  %v366_v56 = vmul.u32.u64.high 2863311531, %v32_v54, %v365_v55  ;;  %s250_s1 = smov [#allocation2]  }
  0x10   :  { %v212_v49 = vpack.c.bf16 %v93_v47, %v91_v46  ;;  %v214_v52 = vpack.c.bf16 %v92_v51, %v90_v50  ;;  %s174_s17 = sshll.u32 %s250_s1, 4  ;;  %s175_s17 = int_to_ptr.vmem [resolvable:$true] %s174_s17 }
  0x11   :  { %199 = vmatpush1.bf16.msra.mxu0 %v198_v30  ;;  %v41_v57 = vshrl.u32 %v366_v56, 1  ;;  %s223_s18 = scalar_lea.vmem %s175_s17, 256  ;;  %p228_p1 = scmp.lt.s32.totalorder %s175_s17, %s175_s17 }
  0x12   :  { %201 = vmatprep.subr.bf16.mxu0 %v200_v31  ;;  %p224_p0 = scmp.ne.s32.totalorder %s175_s17, %s223_s18  ;;  %p229_p2 = scmp.lt.s32.totalorder %s223_s18, %s223_s18 }
  0x13   :  { %v42_v58 = vmul.u32 3, %v41_v57 }
  0x14   :  { %p230_p3 = por %p229_p2, %p228_p1 }
  0x15   :  { %203 = vmatpush1.bf16.msra.mxu0 %v202_v36  ;;  %v43_v59 = vsub.s32 %v32_v54, %v42_v58 }
  0x16   :  { %205 = vmatprep.subr.bf16.mxu0 %v204_v37  ;;  %p231_p4 = pnand %p230_p3, %p224_p0 }
  0x17   :  { %vm46_vm2 = vcmp.ne.s32.totalorder %v43_v59, 0  ;;  %vm47_vm3 = vcmp.lt.s32.totalorder %v43_v59, 0  ;;  %v49_v60 = vadd.s32 3, %v43_v59 }
  0x18   :  { %vm48_vm4 = vmand %vm47_vm3, %vm46_vm2 }
  0x19   :  { %207 = vmatpush1.bf16.msra.mxu0 %v206_v42  ;;  %v50_v61 = vsel %vm48_vm4, %v49_v60, %v43_v59 }
  0x1a   :  { %209 = vmatprep.subr.bf16.mxu0 %v208_v43  ;;  %v51_v62 = vadd.s32 100, %v50_v61 }
  0x1c   :  { %vm58_vm5 = vcmp.eq.s32.totalorder %v53_v63, %v51_v62 }
  0x1d   :  { %211 = vmatpush1.bf16.msra.mxu0 %v210_v48 }
  0x1e   :  { %213 = vmatprep.subr.bf16.mxu0 %v212_v49 }
  0x21   :  { %215 = vmatpush1.bf16.msra.mxu0 %v214_v52 }
  0x85   :  { %v56_v0 = vpop.permute.xlu0 %55 }
  0x86   :  { %vm57_vm6 = vcmp.eq.s32.totalorder %v53_v63, %v56_v0 }
  0x87   :  { %vm59_vm7 = vmor %vm57_vm6, %vm58_vm5 }
  0x88   :  { %183 = vmatmul.mubr.msk.f32.vlgmr.msra.gmra.mrb[0].mxu0 %vm59_vm7, %v249_v1 }
 0x15b   :  { %v160_v2 = vpop.f32.mrb[0].mxu0 }
 0x15c   :  { %165 = vst [vmem:[#allocation2] sm:$0xff] %v160_v2  ;;  %v162_v3 = vpop.f32.mrb[1].mxu0 }
 0x15d   :  { %167 = vst.msk [vmem:[#allocation2 + $0x8] sm:$0xff] %vm166_vm8, %v162_v3 }
 0x15e   :  { %234 = shalt.err (!%p231_p4)
}
 0x15f   :  { %s235_s20 = scalar_lea.hbm %s383_s2, 256 }
 0x160   :  { %p236_p5 = scmp.ne.s32.totalorder %s383_s2, %s235_s20  ;;  %p239_p6 = scmp.lt.u32.totalorder %s235_s20, %s383_s2 }
 0x162   :  { %p241_p7 = pnand %p239_p6, %p236_p5 }
 0x164   :  { %244 = shalt.err (!%p241_p7)
}
 0x165   :  { %177 = dma.vmem_to_hbm [thread:$0]  %s175_s17, 256, %s383_s2, [#allocation3]  }
 0x166   :  { %245 = dma.done.wait [#allocation3], 256  }
 0x167   :  { %246 = vsyncadd [#allocation3], 4294967040 }
 0x168   :  { %181 = vsyncpa [#allocation3], 1 }

</bundles_post_ra>
